<compile_context>
chip_gen: v6e
topology: v6e:2x2x1
jax: 0.10.0
libtpu: 0.0.40
codegen_flags: <defaults>
</compile_context>

<pallas_src>
import functools

import jax
import jax.numpy as jnp
from jax.experimental import pallas as pl
from jax.experimental.pallas import tpu as pltpu

LANE = 128
MAX_TK = 32 * 1024          # sanity cap on slab width (columns per grid step)
NUM_CORE_SPLITS = 2         # split the K reduction across TensorCores (v7x)


def _round_up(x, m):
    return ((x + m - 1) // m) * m


def gram_matrix_jax(x):
    """Pure-JAX reference / init-time gram matrix (matches PyTorch gram_matrix)."""
    a, b, c, d = x.shape
    f = x.reshape(a * b, c * d).astype(jnp.float32)
    return (f @ f.T) / jnp.float32(a * b * c * d)


def _vmem_capacity_bytes():
    """Per-generation VMEM capacity; conservative fallback = v7x's 64 MiB."""
    try:
        info = pltpu.get_tpu_info()
        for name in ("vmem_capacity_bytes", "vmem_size_bytes", "vmem_bytes"):
            cap = getattr(info, name, None)
            if cap:
                return int(cap)
    except Exception:
        pass
    return 64 * 1024 * 1024


def _choose_tiling(M, K, itemsize):
    """Derive (tile_k, num_k_blocks, core_splits, vmem_limit) from M and VMEM."""
    kp = _round_up(K, LANE)
    vmem_cap = _vmem_capacity_bytes()
    budget = int(vmem_cap * 0.7)                       # headroom for compiler scratch
    # Reserve the (1, M, M) f32 output block (assume double-buffered) + slack.
    reserved = 2 * M * M * 4 + (2 << 20)
    avail = max(budget - reserved, 2 * M * LANE * itemsize)
    tk_cap = (avail // (2 * M * itemsize)) // LANE * LANE
    tk_cap = int(max(LANE, min(tk_cap, MAX_TK)))
    tile_k = int(min(kp, tk_cap))
    nk = pl.cdiv(kp, tile_k)
    # Split K across TensorCores only when the block count divides evenly
    # (avoids fully out-of-bounds boundary blocks).
    splits = (NUM_CORE_SPLITS
              if (nk >= NUM_CORE_SPLITS and nk % NUM_CORE_SPLITS == 0) else 1)
    actual = 2 * M * tile_k * itemsize + 2 * M * M * 4 + (4 << 20)
    vmem_limit = int(min(int(vmem_cap * 0.9), actual))
    return tile_k, nk, splits, vmem_limit


def _gram_partial_kernel(f_ref, g_ref, *, k_valid, tile_k, nk_per_split,
                         needs_mask, matmul_dtype):
    """Accumulate one (M, tile_k) feature slab into this core's partial Gram."""
    c = pl.program_id(0)
    k = pl.program_id(1)

    @pl.when(k == 0)
    def _():
        g_ref[...] = jnp.zeros_like(g_ref)

    f = f_ref[...]
    if needs_mask:
        # Zero columns past K on the (single) ragged boundary block; boundary
        # blocks read unspecified data out of bounds.  Cheap VPU op hidden
        # under DMA/MXU — replaces the old host-side jnp.pad copy.
        col0 = (c * nk_per_split + k) * tile_k
        cols = col0 + jax.lax.broadcasted_iota(jnp.int32, f.shape, 1)
        f = jnp.where(cols < k_valid, f, jnp.zeros_like(f))
    if f.dtype != matmul_dtype:
        f = f.astype(matmul_dtype)

    # f @ f.T via a (1,1)-contraction: native transposed-RHS MXU matmul,
    # no XLU transpose of the slab.
    g_ref[...] += jax.lax.dot_general(
        f, f,
        dimension_numbers=(((1,), (1,)), ((), ())),
        preferred_element_type=jnp.float32,
    )[None, :, :]


def style_loss_forward(x, weighted_target, *, use_bf16_matmul=None):
    """Returns the scalar style loss.  The pass-through output is `x` itself
    (returned by the caller without a copy)."""
    B, C, H, W = x.shape
    M = B * C
    K = H * W
    assert weighted_target.shape == (M, M)

    features = x.reshape(M, K)                 # row-major view of NCHW, no copy
    itemsize = jnp.dtype(features.dtype).itemsize

    if use_bf16_matmul is None:
        # Only run the MXU in bf16 when the input already is bf16 (halves HBM
        # read bytes).  Down-casting f32 inputs is opt-in: it changes numerics
        # slightly vs the pure-f32 PyTorch reference.
        use_bf16_matmul = (features.dtype == jnp.bfloat16)
    matmul_dtype = jnp.bfloat16 if use_bf16_matmul else jnp.float32

    tile_k, nk, splits, vmem_limit = _choose_tiling(M, K, itemsize)
    nk_per_split = nk // splits
    needs_mask = (nk * tile_k) != K

    kernel = functools.partial(
        _gram_partial_kernel,
        k_valid=K,
        tile_k=tile_k,
        nk_per_split=nk_per_split,
        needs_mask=needs_mask,
        matmul_dtype=matmul_dtype,
    )

    cost = pl.CostEstimate(
        flops=2 * M * M * K,
        transcendentals=0,
        bytes_accessed=M * K * itemsize + splits * M * M * 4,
    )

    partial_gram = pl.pallas_call(
        kernel,
        out_shape=jax.ShapeDtypeStruct((splits, M, M), jnp.float32),
        grid_spec=pltpu.PrefetchScalarGridSpec(
            num_scalar_prefetch=0,
            grid=(splits, nk_per_split),
            in_specs=[
                # features: one (M, tile_k) slab per step along K; the core
                # index `c` selects which half of the K blocks this core owns.
                pl.BlockSpec((M, tile_k),
                             lambda c, k: (0, c * nk_per_split + k)),
            ],
            # Per-core partial Gram: block index constant in k -> resident
            # accumulator, written back once per core.
            out_specs=pl.BlockSpec((1, M, M), lambda c, k: (c, 0, 0)),
        ),
        compiler_params=pltpu.CompilerParams(
            dimension_semantics=("parallel", "arbitrary"),
            vmem_limit_bytes=vmem_limit,
        ),
        cost_estimate=cost,
    )(features)

    # Tiny O(M^2) finalize in plain JAX: sum per-core partials, normalize,
    # subtract the precomputed weighted target, MSE.  Keeps weighted_target
    # out of kernel VMEM for the entire K loop.
    gram = jnp.sum(partial_gram, axis=0) * (1.0 / float(M * K))
    diff = gram - weighted_target.astype(jnp.float32)
    return jnp.mean(diff * diff)


class StyleLoss2Pallas:
    """Mirror of the PyTorch StyleLoss2 module."""

    def __init__(self, target_feature):
        target_gram = jax.lax.stop_gradient(gram_matrix_jax(target_feature))
        m = target_gram.shape[-1]
        weight = jnp.linspace(0.0, 2.0, m, dtype=jnp.float32)
        # Hoisted out of the per-call path: static across forward calls.
        self.target = target_gram
        self.weight = weight
        self.weighted_target = target_gram * weight[None, :]
        self.loss = None

    def __call__(self, x):
        # TODO(synk): storing self.loss as a Python attribute is a side effect;
        # under jax.jit prefer using style_loss_forward's functional return.
        self.loss = style_loss_forward(x, self.weighted_target)
        return x  # identity pass-through, no copy / no extra HBM traffic


if __name__ == "__main__":
    key = jax.random.PRNGKey(0)
    k_in, k_tgt = jax.random.split(key)

    # Small conv-feature-map shape (NCHW), consistent with the module's inputs.
    shape = (2, 4, 16, 16)   # M = B*C = 8, K = H*W = 256
    x = jax.random.normal(k_in, shape, dtype=jnp.float32)
    target_feature = jax.random.normal(k_tgt, shape, dtype=jnp.float32)

    module = StyleLoss2Pallas(target_feature)
    out = module(x)
    out = jax.block_until_ready(out)
    loss = jax.block_until_ready(module.loss)

    # Pure-JAX reference of the PyTorch forward.
    m = shape[0] * shape[1]
    ref_wt = gram_matrix_jax(target_feature) * jnp.linspace(0.0, 2.0, m)[None, :]
    ref_g = gram_matrix_jax(x)
    ref_loss = jnp.mean((ref_g - ref_wt) ** 2)

    assert out.shape == x.shape and jnp.allclose(out, x), "pass-through mismatch"
    assert jnp.allclose(loss, ref_loss, rtol=1e-5, atol=1e-6), (
        f"style loss mismatch: {loss} vs {ref_loss}")

    print("KERNEL_OK")
</pallas_src>

<mosaic_0001>
module attributes {stable_mosaic.version = 11 : i64} {
  func.func @_gram_partial_kernel(%arg0: i32, %arg1: i32, %arg2: memref<8x256xf32, #tpu.memory_space<vmem>>, %arg3: memref<1x8x8xf32, #tpu.memory_space<vmem>>) attributes {dimension_semantics = [#tpu.dimension_semantics<parallel>, #tpu.dimension_semantics<arbitrary>], iteration_bounds = array<i64: 1, 1>, scalar_prefetch = 0 : i64, scratch_operands = 0 : i64, tpu.core_type = #tpu.core_type<tc>, window_params = [{transform_indices = @transform_0, window_bounds = array<i64: 8, 256>}, {transform_indices = @transform_1, window_bounds = array<i64: 1, 8, 8>}]} {
    %c0_i32 = arith.constant 0 : i32
    %0 = arith.cmpi eq, %arg1, %c0_i32 : i32
    %1 = arith.extui %0 : i1 to i32
    %c0_i32_0 = arith.constant 0 : i32
    %2 = arith.cmpi ne, %1, %c0_i32_0 : i32
    scf.if %2 {
      %cst_8 = arith.constant 0.000000e+00 : f32
      %9 = vector.broadcast %cst_8 : f32 to vector<1x8x8xf32>
      %c0_9 = arith.constant 0 : index
      %c0_10 = arith.constant 0 : index
      %c0_11 = arith.constant 0 : index
      %10 = vector.load %arg3[%c0_9, %c0_10, %c0_11] : memref<1x8x8xf32, #tpu.memory_space<vmem>>, vector<1x8x8xf32>
      tpu.vector_store %arg3[%c0_9, %c0_10, %c0_11], %9 {strides = array<i32>} : memref<1x8x8xf32, #tpu.memory_space<vmem>>, vector<1x8x8xf32>,
    } else {
    }
    %c0 = arith.constant 0 : index
    %c0_1 = arith.constant 0 : index
    %3 = vector.load %arg2[%c0, %c0_1] : memref<8x256xf32, #tpu.memory_space<vmem>>, vector<8x256xf32>
    %c0_2 = arith.constant 0 : index
    %c0_3 = arith.constant 0 : index
    %c0_4 = arith.constant 0 : index
    %4 = vector.load %arg3[%c0_2, %c0_3, %c0_4] : memref<1x8x8xf32, #tpu.memory_space<vmem>>, vector<1x8x8xf32>
    %cst = arith.constant dense<0.000000e+00> : vector<8x8xf32>
    %5 = tpu.matmul %3, %3, %cst {dimension_numbers = #tpu.dot_dimension_numbers<[1], [1], [0], [0], [0, 0, 1, 0], [], []>} : vector<8x256xf32>, vector<8x256xf32>, vector<8x8xf32> -> vector<8x8xf32>
    %6 = vector.shape_cast %5 : vector<8x8xf32> to vector<1x8x8xf32>
    %7 = arith.addf %4, %6 : vector<1x8x8xf32>
    %c0_5 = arith.constant 0 : index
    %c0_6 = arith.constant 0 : index
    %c0_7 = arith.constant 0 : index
    %8 = vector.load %arg3[%c0_5, %c0_6, %c0_7] : memref<1x8x8xf32, #tpu.memory_space<vmem>>, vector<1x8x8xf32>
    tpu.vector_store %arg3[%c0_5, %c0_6, %c0_7], %7 {strides = array<i32>} : memref<1x8x8xf32, #tpu.memory_space<vmem>>, vector<1x8x8xf32>,
    return
  }
  func.func @transform_0(%arg0: i32, %arg1: i32) -> (i32, i32) {
    %c1_i32 = arith.constant 1 : i32
    %0 = arith.muli %arg0, %c1_i32 : i32
    %1 = arith.addi %0, %arg1 : i32
    %c0_i32 = arith.constant 0 : i32
    %c0_i32_0 = arith.constant 0 : i32
    return %c0_i32, %1 : i32, i32
  }
  func.func @transform_1(%arg0: i32, %arg1: i32) -> (i32, i32, i32) {
    %c0_i32 = arith.constant 0 : i32
    %c0_i32_0 = arith.constant 0 : i32
    %c0_i32_1 = arith.constant 0 : i32
    return %arg0, %c0_i32, %c0_i32_0 : i32, i32, i32
  }
}

</mosaic_0001>

<bundles_post_ra>
// kernel: tpu_custom_call.1
= control target key start
LH: loop header
LB: loop body
LE: loop exit
PB: predicated region body
PF: predicated region fallthrough
CT: control target
= control target key end

     0   :  { %6 = vsyncpa [#allocation3], 0  ;;  %s192_s0 = inlined_call_operand.hbm [shape: f32[8,256], index: 0, kind: input, shape index: {}]   ;;  %s193_s1 = inlined_call_operand.hbm [shape: f32[1,8,8], index: 1, kind: output, shape index: {}]  }
   0x1   :  { %7 = vsyncpa [#allocation4], 0  ;;  %s171_s6 = smov [#allocation2]  }
   0x2   :  { %s18_s7 = sshll.u32 %s171_s6, 4  ;;  %s19_s7 = int_to_ptr.vmem [resolvable:$true] %s18_s7 }
   0x3   :  { %s135_s8 = scalar_lea.vmem %s19_s7, 256  ;;  %p140_p1 = scmp.lt.s32.totalorder %s19_s7, %s19_s7 }
   0x4   :  { %p136_p0 = scmp.ne.s32.totalorder %s19_s7, %s135_s8  ;;  %p141_p2 = scmp.lt.s32.totalorder %s135_s8, %s135_s8 }
   0x6   :  { %p142_p3 = por %p141_p2, %p140_p1 }
   0x8   :  { %p143_p4 = pnand %p142_p3, %p136_p0 }
   0xa   :  { %146 = shalt.err (!%p143_p4)
}
   0xb   :  { %21 = dma.hbm_to_vmem [thread:$0]  %s192_s0, 256, %s19_s7, [#allocation3]  }
   0xc   :  { %167 = dma.done.wait [#allocation3], 256  }
   0xd   :  { %168 = vsyncadd [#allocation3], 4294967040  ;;  %vm31_vm0 = vcmask 64512   ;;  %v172_v0 = vmov 0.0   ;;  %v34_v1 = vld [vmem:[#allocation2 + $0x8] sm:$0xff]  ;;  %v33_v2 = vld [vmem:[#allocation2] sm:$0xff] }
   0xe   :  { %32 = vst.msk [vmem:[#allocation5] sm:$0xff] %vm31_vm0, %v172_v0  ;;  %66 = vmatprep.subr.mxu0 %v34_v1  ;;  %100 = vmatprep.mubr.f32.mxu0 %v34_v1  ;;  %s173_s11 = smov [#allocation5]  }
   0xf   :  { %67 = vmatpush1.xpose.msra.mxu0 %v33_v2  ;;  %s115_s12 = sshll.u32 %s173_s11, 4  ;;  %s116_s12 = int_to_ptr.vmem [resolvable:$true] %s115_s12 }
  0x10   :  { %s147_s0 = scalar_lea.vmem %s116_s12, 128  ;;  %p152_p6 = scmp.lt.s32.totalorder %s116_s12, %s116_s12 }
  0x11   :  { %p148_p5 = scmp.ne.s32.totalorder %s116_s12, %s147_s0  ;;  %p153_p7 = scmp.lt.s32.totalorder %s147_s0, %s147_s0 }
  0x12   :  { %101 = vmatmul.mubr.f32.vlgmr.msra.gmra.mxu0 %v33_v2 }
  0x13   :  { %p154_p8 = por %p153_p7, %p152_p6 }
  0x15   :  { %v35_v3 = vld [vmem:[#allocation5] sm:$0xff]  ;;  %p155_p9 = pnand %p154_p8, %p148_p5 }
  0xd2   :  { %v102_v4 = vpop.f32.mrf.mxu0 }
  0xd3   :  { %v106_v5 = vadd.f32 %v102_v4, %v35_v3 }
  0xd4   :  { %v104_v6 = vpop.f32.mrf.mxu0 }
  0xd5   :  { %108 = vst.msk [vmem:[#allocation5] sm:$0xff] %vm31_vm0, %v106_v5 }
  0xd6   :  { %158 = shalt.err (!%p155_p9)
}
  0xd7   :  { %118 = dma.vmem_to_hbm [thread:$0]  %s116_s12, 128, %s193_s1, [#allocation4]  }
  0xd8   :  { %169 = dma.done.wait [#allocation4], 128  }
  0xd9   :  { %170 = vsyncadd [#allocation4], 4294967168 }
  0xda   :  { %122 = vsyncpa [#allocation3], 1 }
  0xdb   :  { %123 = vsyncpa [#allocation4], 1 }

</bundles_post_ra>
